<compile_context>
chip_gen: v6e
topology: v6e:2x2x1
jax: 0.10.0
libtpu: 0.0.40
codegen_flags: <defaults>
</compile_context>

<pallas_src>
import math

import jax
import jax.numpy as jnp
from jax.experimental import pallas as pl
from jax.experimental.pallas import tpu as pltpu


def _ste_relu_kernel(x_ref, o_ref):
    # Pure VPU elementwise max on one (row_tile, lane) tile per grid step.
    o_ref[...] = jnp.maximum(x_ref[...], 0)


# Preferred lane widths (multiples of 128, largest first) for the folded layout.
_LANE_CANDIDATES = (2048, 1024, 512, 256, 128)
# Lane width used when the total element count is ragged (pad + slice path).
_PAD_LANE = 1024
# ~4 MiB per block -> 4x (double-buffered input + output) = ~16 MiB VMEM footprint.
_TARGET_BLOCK_BYTES = 4 * 1024 * 1024
# Explicit scoped-VMEM limit: <= physical on every generation (v7x: 64 MiB/TC),
# and above v5e's 16 MiB scoped default so the 4 MiB blocks are legal there too.
_VMEM_LIMIT_BYTES = 32 * 1024 * 1024
# Below this, kernel launch + DMA setup dominates: just let XLA fuse the max.
_SMALL_INPUT_BYTES = 1 * 1024 * 1024


def _cdiv(a: int, b: int) -> int:
    return -(-a // b)


def _sublane_multiple(dtype) -> int:
    # f32 -> 8, bf16/f16 -> 16, int8/fp8 -> 32 (sub-32-bit dtypes pack along sublanes).
    itemsize = jnp.dtype(dtype).itemsize
    return max(8, 32 // max(itemsize, 1))


def _choose_row_tile(rows: int, lane: int, itemsize: int, sub: int) -> int:
    """Largest row tile (multiple of `sub`) fitting the block-byte target, nudged
    so the number of grid steps is even when that matters (v7x 2-TC balance)."""
    if rows <= sub:
        return rows  # full-extent row dim is always legal
    rt_max = max(sub, (_TARGET_BLOCK_BYTES // (lane * itemsize)) // sub * sub)
    if rt_max >= rows:
        # Whole array fits one block: split in two so both v7x TensorCores get
        # work (and step 1's input DMA overlaps step 0's output DMA).
        if rows >= 2 * sub:
            return _cdiv(_cdiv(rows, 2), sub) * sub
        return rows
    steps = _cdiv(rows, rt_max)
    if steps % 2 == 0 or steps > 16:
        # Even already, or enough steps that a 1-step imbalance is negligible.
        return rt_max
    # Odd and small (e.g. 3 steps -> one core does 2x the work): try the next
    # even step count with a slightly smaller tile; keep rt_max if rounding to
    # the sublane multiple pushes the count back to odd.
    rt_even = max(sub, _cdiv(_cdiv(rows, steps + 1), sub) * sub)
    if _cdiv(rows, rt_even) % 2 == 0:
        return rt_even
    return rt_max


def ste_relu(x: jax.Array, *, donate_input: bool = False,
             min_kernel_bytes: int = _SMALL_INPUT_BYTES) -> jax.Array:
    """max(x, 0) elementwise via a Pallas TPU kernel. Preserves shape and dtype.

    donate_input=True adds input_output_aliases={0: 0}; pair with buffer
    donation at the jit boundary to reuse the input's HBM for the output.
    """
    orig_shape = x.shape
    dtype = x.dtype
    total = math.prod(orig_shape) if orig_shape else 1
    itemsize = jnp.dtype(dtype).itemsize

    # Small-tensor bailout: a standalone pallas_call is pure overhead here, and
    # ideally this ReLU is fused into its producer by XLA anyway.
    if total == 0 or total * itemsize < min_kernel_bytes:
        return jnp.maximum(x, 0)

    # ---- choose a lane-dense 2D layout (elementwise => layout is free) ----
    lane = next((l for l in _LANE_CANDIDATES if total % l == 0), None)
    if lane is None:
        # Ragged total: pad the flat array to a multiple of 1024 (8x128) so the
        # kernel still streams unmasked, lane-dense stores; slice back after.
        lane = _PAD_LANE
        padded_total = _cdiv(total, lane) * lane
        flat = jnp.pad(x.reshape(-1), (0, padded_total - total))
    else:
        padded_total = total
        flat = x.reshape(-1)
    rows = padded_total // lane
    x2 = flat.reshape(rows, lane)

    # ---- dtype-aware row tile sized for ~_TARGET_BLOCK_BYTES per block ----
    sub = _sublane_multiple(dtype)
    row_tile = _choose_row_tile(rows, lane, itemsize, sub)
    # No explicit row padding: cdiv grid + Pallas edge-block masking handles the tail.
    grid = (_cdiv(rows, row_tile),)

    out2 = pl.pallas_call(
        _ste_relu_kernel,
        out_shape=jax.ShapeDtypeStruct((rows, lane), dtype),
        grid_spec=pltpu.PrefetchScalarGridSpec(
            num_scalar_prefetch=0,
            grid=grid,
            # If an xprof trace ever shows DMA gaps between steps, the input spec
            # can take pipeline_mode=pl.Buffered(3); not enabled by default to
            # keep the VMEM footprint at 4 buffers on v7x's tighter VMEM.
            in_specs=[pl.BlockSpec((row_tile, lane), lambda i: (i, 0))],
            out_specs=pl.BlockSpec((row_tile, lane), lambda i: (i, 0)),
        ),
        compiler_params=pltpu.CompilerParams(
            dimension_semantics=("parallel",),        # v7x: split grid across 2 TCs
            vmem_limit_bytes=_VMEM_LIMIT_BYTES,       # explicit: safe on v5e/v6e/v7x
        ),
        input_output_aliases=({0: 0} if donate_input else {}),
    )(x2)

    if padded_total != total:
        return out2.reshape(-1)[:total].reshape(orig_shape)
    return out2.reshape(orig_shape)


# TODO(synk): backward pass (straight-through estimator: grad = hardtanh(grad_out))
# is intentionally not implemented; only the forward clamp(min=0) is ported.


if __name__ == "__main__":
    key = jax.random.PRNGKey(0)

    # Small NCHW input consistent with the module's usage (elementwise activation).
    x = jax.random.normal(key, (2, 4, 16, 16), dtype=jnp.float32)

    # Force the kernel path (min_kernel_bytes=0) so the Pallas code is exercised
    # even at this small test size; production calls use the default bailout.
    out = jax.block_until_ready(ste_relu(x, min_kernel_bytes=0))
    ref = jnp.maximum(x, 0.0)
    assert out.shape == x.shape and out.dtype == x.dtype
    assert jnp.allclose(out, ref), "Mismatch vs reference ReLU (f32, lane-dense path)"

    # bf16 path (dtype-aware sublane tiling).
    xb = x.astype(jnp.bfloat16)
    outb = jax.block_until_ready(ste_relu(xb, min_kernel_bytes=0))
    assert outb.dtype == jnp.bfloat16 and outb.shape == xb.shape
    assert jnp.allclose(outb.astype(jnp.float32),
                        jnp.maximum(xb, 0).astype(jnp.float32)), "Mismatch (bf16 path)"

    # Ragged total (not a multiple of 128): exercises the pad -> lane-dense -> slice path.
    xr = jax.random.normal(jax.random.PRNGKey(1), (3, 5, 7), dtype=jnp.float32)
    outr = jax.block_until_ready(ste_relu(xr, min_kernel_bytes=0))
    assert outr.shape == xr.shape and outr.dtype == xr.dtype
    assert jnp.allclose(outr, jnp.maximum(xr, 0.0)), "Mismatch (ragged pad/slice path)"

    # Default small-tensor bailout path (no pallas_call) still matches semantics.
    outd = jax.block_until_ready(ste_relu(x))
    assert jnp.allclose(outd, ref), "Mismatch (small-tensor bailout path)"

    print("KERNEL_OK")
</pallas_src>

<mosaic_0001>
module attributes {stable_mosaic.version = 11 : i64} {
  func.func @_ste_relu_kernel(%arg0: i32, %arg1: memref<1x2048xf32, #tpu.memory_space<vmem>>, %arg2: memref<1x2048xf32, #tpu.memory_space<vmem>>) attributes {dimension_semantics = [#tpu.dimension_semantics<parallel>], iteration_bounds = array<i64: 1>, scalar_prefetch = 0 : i64, scratch_operands = 0 : i64, tpu.core_type = #tpu.core_type<tc>, window_params = [{transform_indices = @transform_0, window_bounds = array<i64: 1, 2048>}, {transform_indices = @transform_1, window_bounds = array<i64: 1, 2048>}]} {
    %c0 = arith.constant 0 : index
    %c0_0 = arith.constant 0 : index
    %0 = vector.load %arg1[%c0, %c0_0] : memref<1x2048xf32, #tpu.memory_space<vmem>>, vector<1x2048xf32>
    %cst = arith.constant 0.000000e+00 : f32
    %1 = vector.broadcast %cst : f32 to vector<1x2048xf32>
    %2 = arith.maximumf %0, %1 : vector<1x2048xf32>
    %c0_1 = arith.constant 0 : index
    %c0_2 = arith.constant 0 : index
    %3 = vector.load %arg2[%c0_1, %c0_2] : memref<1x2048xf32, #tpu.memory_space<vmem>>, vector<1x2048xf32>
    tpu.vector_store %arg2[%c0_1, %c0_2], %2 {strides = array<i32>} : memref<1x2048xf32, #tpu.memory_space<vmem>>, vector<1x2048xf32>,
    return
  }
  func.func @transform_0(%arg0: i32) -> (i32, i32) {
    %c0_i32 = arith.constant 0 : i32
    %c0_i32_0 = arith.constant 0 : i32
    return %arg0, %c0_i32 : i32, i32
  }
  func.func @transform_1(%arg0: i32) -> (i32, i32) {
    %c0_i32 = arith.constant 0 : i32
    %c0_i32_0 = arith.constant 0 : i32
    return %arg0, %c0_i32 : i32, i32
  }
}

</mosaic_0001>

<bundles_post_ra>
// kernel: tpu_custom_call.1
= control target key start
LH: loop header
LB: loop body
LE: loop exit
PB: predicated region body
PF: predicated region fallthrough
CT: control target
= control target key end

     0   :  { %6 = vsyncpa [#allocation3], 0  ;;  %s106_s0 = inlined_call_operand.hbm [shape: f32[1,2048], index: 0, kind: input, shape index: {}]   ;;  %s107_s1 = inlined_call_operand.hbm [shape: f32[1,2048], index: 1, kind: output, shape index: {}]  }
   0x1   :  { %7 = vsyncpa [#allocation4], 0  ;;  %s88_s6 = smov [#allocation2]  }
   0x2   :  { %s14_s7 = sshll.u32 %s88_s6, 4  ;;  %s15_s7 = int_to_ptr.vmem [resolvable:$true] %s14_s7 }
   0x3   :  { %s52_s8 = scalar_lea.vmem %s15_s7, 256  ;;  %p57_p1 = scmp.lt.s32.totalorder %s15_s7, %s15_s7 }
   0x4   :  { %p53_p0 = scmp.ne.s32.totalorder %s15_s7, %s52_s8  ;;  %p58_p2 = scmp.lt.s32.totalorder %s52_s8, %s52_s8 }
   0x6   :  { %p59_p3 = por %p58_p2, %p57_p1 }
   0x8   :  { %p60_p4 = pnand %p59_p3, %p53_p0 }
   0xa   :  { %63 = shalt.err (!%p60_p4)
}
   0xb   :  { %17 = dma.hbm_to_vmem [thread:$0]  %s106_s0, 256, %s15_s7, [#allocation3]  }
   0xc   :  { %84 = dma.done.wait [#allocation3], 256  }
   0xd   :  { %85 = vsyncadd [#allocation3], 4294967040  ;;  %s89_s11 = smov [#allocation5]   ;;  %v21_v0 = vld [vmem:[#allocation2] sm:$0xff]  ;;  %v22_v1 = vld [vmem:[#allocation2 + $0x8] sm:$0xff] }
   0xe   :  { %s33_s12 = sshll.u32 %s89_s11, 4  ;;  %v23_v2 = vmax.f32 %v21_v0, 0.0  ;;  %v24_v3 = vmax.f32 %v22_v1, 0.0  ;;  %s34_s12 = int_to_ptr.vmem [resolvable:$true] %s33_s12 }
   0xf   :  { %s64_s13 = scalar_lea.vmem %s34_s12, 256  ;;  %p69_p6 = scmp.lt.s32.totalorder %s34_s12, %s34_s12 }
  0x10   :  { %25 = vst [vmem:[#allocation5] sm:$0xff] %v23_v2  ;;  %26 = vst [vmem:[#allocation5 + $0x8] sm:$0xff] %v24_v3  ;;  %p65_p5 = scmp.ne.s32.totalorder %s34_s12, %s64_s13  ;;  %p70_p7 = scmp.lt.s32.totalorder %s64_s13, %s64_s13 }
  0x12   :  { %p71_p8 = por %p70_p7, %p69_p6 }
  0x14   :  { %p72_p9 = pnand %p71_p8, %p65_p5 }
  0x16   :  { %75 = shalt.err (!%p72_p9)
}
  0x17   :  { %36 = dma.vmem_to_hbm [thread:$0]  %s34_s12, 256, %s107_s1, [#allocation4]  }
  0x18   :  { %86 = dma.done.wait [#allocation4], 256  }
  0x19   :  { %87 = vsyncadd [#allocation4], 4294967040 }
  0x1a   :  { %40 = vsyncpa [#allocation3], 1 }
  0x1b   :  { %41 = vsyncpa [#allocation4], 1 }

</bundles_post_ra>
